<compile_context>
chip_gen: v6e
topology: v6e:2x2x1
jax: 0.10.0
libtpu: 0.0.40
codegen_flags: <defaults>
</compile_context>

<pallas_src>
import math
import functools

import jax
import jax.numpy as jnp
from jax.experimental import pallas as pl
from jax.experimental.pallas import tpu as pltpu


# ----------------------------- kernels ------------------------------------


def _pe_kernel(emb_ref, pe_ref, out_ref, *, scale):
    # emb_ref: (tS, D) or (B, N).  pe_ref broadcasts against it:
    #   (tS, D) [per-position rows], (1, D) [step row], or (1, N) [flattened].
    y = emb_ref[...].astype(jnp.float32) * scale + pe_ref[...]
    out_ref[...] = y.astype(out_ref.dtype)


def _pe_dropout_kernel(emb_ref, pe_ref, bits_ref, out_ref, *,
                       scale, keep_threshold, inv_keep):
    # Inverted dropout: keep iff bits < keep_threshold (P = keep_prob), scale by 1/keep_prob.
    y = emb_ref[...].astype(jnp.float32) * scale + pe_ref[...]
    keep = bits_ref[...] < jnp.uint32(keep_threshold)
    out_ref[...] = jnp.where(keep, y * inv_keep, 0.0).astype(out_ref.dtype)


# ----------------------------- helpers -------------------------------------


def make_pe_table(max_len: int, dim: int) -> jnp.ndarray:
    """Replicates the PyTorch __init__ pe buffer (shape [max_len, dim], f32)."""
    position = jnp.arange(max_len, dtype=jnp.float32)[:, None]
    div_term = jnp.exp(
        jnp.arange(0, dim, 2, dtype=jnp.float32) * -(math.log(10000.0) / dim)
    )
    ang = position * div_term
    pe = jnp.zeros((max_len, dim), jnp.float32)
    pe = pe.at[:, 0::2].set(jnp.sin(ang))
    pe = pe.at[:, 1::2].set(jnp.cos(ang))
    return pe


_SMALL_BYTES = 1 * 1024 * 1024          # whole-tensor single-block path threshold
_TILE_TARGET_BYTES = 2 * 1024 * 1024    # ~2 MiB f32 per emb block on the tiled path


def _seq_tile(S: int, D: int) -> int:
    """Pick tS so one (tS, D) f32 block is ~_TILE_TARGET_BYTES (multiple of 8 rows)."""
    rows = max(1, _TILE_TARGET_BYTES // (D * 4))
    if rows >= S:
        return S
    return max(8, (rows // 8) * 8)


# ----------------------------- wrapper -------------------------------------


def positional_encoding(
    emb: jnp.ndarray,
    pe: jnp.ndarray,
    *,
    dropout_p: float = 0.0,
    training: bool = False,
    step=None,
    rng_key=None,
) -> jnp.ndarray:
    """Pallas forward of PositionalEncoding. emb: [B, S, D]."""
    B, S, D = emb.shape
    scale = math.sqrt(D)

    use_dropout = training and dropout_p > 0.0
    if use_dropout:
        if rng_key is None:
            rng_key = jax.random.PRNGKey(0)
        keep_prob = 1.0 - dropout_p
        keep_threshold = min((1 << 32) - 1, int(round(keep_prob * float(1 << 32))))
        inv_keep = 1.0 / keep_prob
        bits = jax.random.bits(rng_key, (B, S, D), jnp.uint32)

    # Mirror the PyTorch `if step:` (step == 0 falls through to the positional branch).
    if step:
        pe_row = pe[step][None, :]      # (1, D) -> broadcast over seq in-kernel
    else:
        pe_rows = pe[:S, :]             # (S, D)

    total_bytes = B * S * D * emb.dtype.itemsize

    # ---- tiny-problem path: one invocation, no grid, lane-dense [B, S*D] -----
    if total_bytes <= _SMALL_BYTES:
        N = S * D
        emb2d = emb.reshape(B, N)
        if step:
            pe2d = jnp.broadcast_to(pe_row, (S, D)).reshape(1, N)
        else:
            pe2d = pe_rows.reshape(1, N)

        if use_dropout:
            kernel = functools.partial(
                _pe_dropout_kernel, scale=scale,
                keep_threshold=keep_threshold, inv_keep=inv_keep)
            out2d = pl.pallas_call(
                kernel,
                out_shape=jax.ShapeDtypeStruct((B, N), emb.dtype),
            )(emb2d, pe2d, bits.reshape(B, N))
        else:
            kernel = functools.partial(_pe_kernel, scale=scale)
            out2d = pl.pallas_call(
                kernel,
                out_shape=jax.ShapeDtypeStruct((B, N), emb.dtype),
            )(emb2d, pe2d)
        return out2d.reshape(B, S, D)

    # ---- general path: grid = (S_tiles, B), pe tile resident across inner axis ----
    tS = _seq_tile(S, D)
    grid = (pl.cdiv(S, tS), B)

    emb_spec = pl.BlockSpec((None, tS, D), lambda s, b: (b, s, 0))
    out_spec = pl.BlockSpec((None, tS, D), lambda s, b: (b, s, 0))
    if step:
        pe_arr = pe_row                                   # (1, D)
        pe_spec = pl.BlockSpec((1, D), lambda s, b: (0, 0))
    else:
        pe_arr = pe_rows                                  # (S, D)
        pe_spec = pl.BlockSpec((tS, D), lambda s, b: (s, 0))

    cparams = pltpu.CompilerParams(
        dimension_semantics=("parallel", "parallel"),
        vmem_limit_bytes=32 * 1024 * 1024,
    )
    out_shape = jax.ShapeDtypeStruct((B, S, D), emb.dtype)

    if use_dropout:
        bits_spec = pl.BlockSpec((None, tS, D), lambda s, b: (b, s, 0))
        kernel = functools.partial(
            _pe_dropout_kernel, scale=scale,
            keep_threshold=keep_threshold, inv_keep=inv_keep)
        return pl.pallas_call(
            kernel,
            out_shape=out_shape,
            grid=grid,
            in_specs=[emb_spec, pe_spec, bits_spec],
            out_specs=out_spec,
            compiler_params=cparams,
        )(emb, pe_arr, bits)

    kernel = functools.partial(_pe_kernel, scale=scale)
    return pl.pallas_call(
        kernel,
        out_shape=out_shape,
        grid=grid,
        in_specs=[emb_spec, pe_spec],
        out_specs=out_spec,
        compiler_params=cparams,
    )(emb, pe_arr)


# ----------------------------- main ----------------------------------------


if __name__ == "__main__":
    B, S, D = 2, 8, 32
    MAX_LEN = 5000
    DROPOUT_P = 0.1

    key = jax.random.PRNGKey(0)
    k_emb, k_drop, k_big = jax.random.split(key, 3)
    emb = jax.random.normal(k_emb, (B, S, D), dtype=jnp.float32)
    pe = make_pe_table(MAX_LEN, D)

    # eval mode (dropout identity) -> tiny single-block path
    out = jax.block_until_ready(
        positional_encoding(emb, pe, dropout_p=DROPOUT_P, training=False))
    ref = emb * math.sqrt(D) + pe[:S][None, :, :]
    assert out.shape == (B, S, D)
    assert jnp.allclose(out, ref, atol=1e-5, rtol=1e-5), "mismatch vs reference"

    # step branch (pe[step] row broadcast over seq)
    step = 3
    out_step = jax.block_until_ready(
        positional_encoding(emb, pe, dropout_p=DROPOUT_P, training=False, step=step))
    ref_step = emb * math.sqrt(D) + pe[step][None, None, :]
    assert jnp.allclose(out_step, ref_step, atol=1e-5, rtol=1e-5)

    # training-mode dropout (mask from external random bits; not bit-identical to torch RNG)
    out_train = jax.block_until_ready(
        positional_encoding(emb, pe, dropout_p=DROPOUT_P, training=True, rng_key=k_drop))
    keep_prob = 1.0 - DROPOUT_P
    scaled = ref / keep_prob
    ok = jnp.isclose(out_train, scaled, atol=1e-5, rtol=1e-5) | \
         jnp.isclose(out_train, 0.0, atol=1e-6)
    assert bool(jnp.all(ok)), "dropout output not in {0, ref/keep_prob}"

    # exercise the tiled general path (grid=(S_tiles, B)) at a moderate size
    Bg, Sg, Dg = 2, 1024, 1024
    emb_big = jax.random.normal(k_big, (Bg, Sg, Dg), dtype=jnp.float32)
    pe_big = make_pe_table(Sg, Dg)
    out_big = jax.block_until_ready(
        positional_encoding(emb_big, pe_big, dropout_p=DROPOUT_P, training=False))
    ref_big = emb_big * math.sqrt(Dg) + pe_big[:Sg][None, :, :]
    assert jnp.allclose(out_big, ref_big, atol=1e-4, rtol=1e-5)

    print("KERNEL_OK")
</pallas_src>

<mosaic_0001>
module attributes {stable_mosaic.version = 11 : i64} {
  func.func @_pe_kernel(%arg0: memref<2x256xf32, #tpu.memory_space<vmem>>, %arg1: memref<1x256xf32, #tpu.memory_space<vmem>>, %arg2: memref<2x256xf32, #tpu.memory_space<vmem>>) attributes {dimension_semantics = [], scalar_prefetch = 0 : i64, scratch_operands = 0 : i64, tpu.core_type = #tpu.core_type<tc>} {
    %c0 = arith.constant 0 : index
    %c0_0 = arith.constant 0 : index
    %0 = vector.load %arg0[%c0, %c0_0] : memref<2x256xf32, #tpu.memory_space<vmem>>, vector<2x256xf32>
    %cst = arith.constant 5.65685415 : f32
    %1 = vector.broadcast %cst : f32 to vector<2x256xf32>
    %2 = arith.mulf %0, %1 : vector<2x256xf32>
    %c0_1 = arith.constant 0 : index
    %c0_2 = arith.constant 0 : index
    %3 = vector.load %arg1[%c0_1, %c0_2] : memref<1x256xf32, #tpu.memory_space<vmem>>, vector<1x256xf32>
    %4 = vector.broadcast %3 : vector<1x256xf32> to vector<2x256xf32>
    %5 = arith.addf %2, %4 : vector<2x256xf32>
    %c0_3 = arith.constant 0 : index
    %c0_4 = arith.constant 0 : index
    %6 = vector.load %arg2[%c0_3, %c0_4] : memref<2x256xf32, #tpu.memory_space<vmem>>, vector<2x256xf32>
    tpu.vector_store %arg2[%c0_3, %c0_4], %5 {strides = array<i32>} : memref<2x256xf32, #tpu.memory_space<vmem>>, vector<2x256xf32>,
    return
  }
}

</mosaic_0001>

<bundles_post_ra>
// kernel: tpu_custom_call.1
= control target key start
LH: loop header
LB: loop body
LE: loop exit
PB: predicated region body
PF: predicated region fallthrough
CT: control target
= control target key end

     0   :  { %7 = vsyncpa [#allocation3], 0  ;;  %s173_s0 = inlined_call_operand.hbm [shape: f32[2,256], index: 0, kind: input, shape index: {}]   ;;  %s174_s1 = inlined_call_operand.hbm [shape: f32[1,256], index: 1, kind: input, shape index: {}]   ;;  %s175_s2 = inlined_call_operand.hbm [shape: f32[2,256], index: 2, kind: output, shape index: {}]  }
   0x1   :  { %8 = vsyncpa [#allocation6], 0 }
   0x2   :  { %9 = vsyncpa [#allocation4], 0  ;;  %s145_s9 = smov [#allocation2]   ;;  %s146_s11 = smov [#allocation5]  }
   0x3   :  { %s16_s10 = sshll.u32 %s145_s9, 4  ;;  %s26_s12 = sshll.u32 %s146_s11, 4  ;;  %s17_s10 = int_to_ptr.vmem [resolvable:$true] %s16_s10  ;;  %s27_s12 = int_to_ptr.vmem [resolvable:$true] %s26_s12 }
   0x4   :  { %s87_s13 = scalar_lea.vmem %s17_s10, 64  ;;  %p92_p1 = scmp.lt.s32.totalorder %s17_s10, %s17_s10 }
   0x5   :  { %p88_p0 = scmp.ne.s32.totalorder %s17_s10, %s87_s13  ;;  %p93_p2 = scmp.lt.s32.totalorder %s87_s13, %s87_s13 }
   0x7   :  { %p94_p3 = por %p93_p2, %p92_p1 }
   0x9   :  { %p95_p4 = pnand %p94_p3, %p88_p0 }
   0xb   :  { %98 = shalt.err (!%p95_p4)
}
   0xc   :  { %19 = dma.hbm_to_vmem [thread:$0]  %s173_s0, 64, %s17_s10, [#allocation3]  }
   0xd   :  { %s107_s16 = scalar_lea.vmem %s27_s12, 32  ;;  %p112_p6 = scmp.lt.s32.totalorder %s27_s12, %s27_s12 }
   0xe   :  { %p108_p5 = scmp.ne.s32.totalorder %s27_s12, %s107_s16  ;;  %p113_p7 = scmp.lt.s32.totalorder %s107_s16, %s107_s16 }
  0x10   :  { %p114_p8 = por %p113_p7, %p112_p6 }
  0x12   :  { %p115_p9 = pnand %p114_p8, %p108_p5 }
  0x14   :  { %118 = shalt.err (!%p115_p9)
}
  0x15   :  { %29 = dma.hbm_to_vmem [thread:$0]  %s174_s1, 32, %s27_s12, [#allocation6]  }
  0x16   :  { %139 = dma.done.wait [#allocation3], 64  }
  0x17   :  { %140 = vsyncadd [#allocation3], 4294967232 }
  0x18   :  { %141 = dma.done.wait [#allocation6], 32  }
  0x19   :  { %142 = vsyncadd [#allocation6], 4294967264  ;;  %v40_v0 = vlaneseq  ;;  %v147_v1 = vmov 1983009808   ;;  %v36_v7 = vld [vmem:[#allocation2] sm:$0xf] }
  0x1a   :  { %v50_v2 = vunpack.c.l.s4 %v147_v1  ;;  %v38_v8 = vld [vmem:[#allocation5] sm:$0x3]  ;;  %v37_v12 = vmul.f32 5.656854, %v36_v7  ;;  %s148_s0 = smov [#allocation7]  }
  0x1b   :  { %v41_v3 = vshrl.u32 %v40_v0, 7  ;;  %s65_s1 = sshll.u32 %s148_s0, 4  ;;  %s66_s1 = int_to_ptr.vmem [resolvable:$true] %s65_s1 }
  0x1c   :  { %v51_v6 = vunpack.c.0.s8 %v50_v2  ;;  %s119_s19 = scalar_lea.vmem %s66_s1, 64  ;;  %p124_p11 = scmp.lt.s32.totalorder %s66_s1, %s66_s1 }
  0x1d   :  { %v42_v4 = vsub.s32 0, %v41_v3  ;;  %v46_v5 = vsub.s32 1, %v41_v3  ;;  %p120_p10 = scmp.ne.s32.totalorder %s66_s1, %s119_s19  ;;  %p125_p12 = scmp.lt.s32.totalorder %s119_s19, %s119_s19 }
  0x1e   :  { %v54_v11 = vsub.s32 %v51_v6, %v41_v3 }
  0x1f   :  { %v43_v9 = vrot.slane %v38_v8, %v42_v4  ;;  %v47_v10 = vrot.slane %v38_v8, %v46_v5  ;;  %p126_p13 = por %p125_p12, %p124_p11 }
  0x21   :  { %v48_v13 = vcombine.low %v43_v9, %v47_v10  ;;  %p127_p0 = pnand %p126_p13, %p120_p10 }
  0x23   :  { %v55_v14 = vrot.slane %v48_v13, %v54_v11 }
  0x25   :  { %v57_v15 = vadd.f32 %v55_v14, %v37_v12 }
  0x27   :  { %58 = vst [vmem:[#allocation7] sm:$0xf] %v57_v15 }
  0x28   :  { %130 = shalt.err (!%p127_p0)
}
  0x29   :  { %68 = dma.vmem_to_hbm [thread:$0]  %s66_s1, 64, %s175_s2, [#allocation4]  }
  0x2a   :  { %143 = dma.done.wait [#allocation4], 64  }
  0x2b   :  { %144 = vsyncadd [#allocation4], 4294967232 }
  0x2c   :  { %72 = vsyncpa [#allocation3], 1 }
  0x2d   :  { %73 = vsyncpa [#allocation6], 1 }
  0x2e   :  { %74 = vsyncpa [#allocation4], 1 }

</bundles_post_ra>
